<compile_context>
chip_gen: v7x
topology: tpu7x:2x2x1
jax: 0.10.0
libtpu: 0.0.40
codegen_flags: <defaults>
</compile_context>

<pallas_src>
import jax
import jax.numpy as jnp
from jax.experimental import pallas as pl
from jax.experimental.pallas import tpu as pltpu

A_WIDTH = 4 * 4                 # 16
B_WIDTH = 4 * 2                 # 8
HEAD_WIDTH = A_WIDTH + B_WIDTH  # 24
LANE = 128                      # lane width: batch tiles are multiples of this
TILE_B_MAX = 2048               # lane-dense tiles are tiny; amortize per-step overhead

_HP = jax.lax.Precision.HIGHEST  # explicit: full-f32 MXU passes, matches torch f32


def _cdiv(a, b):
    return (a + b - 1) // b


def _round_up(n, m):
    return ((n + m - 1) // m) * m


def mlp_ab_kernel(xt_ref, w1_ref, b1_ref, w2_ref, b2_ref, wh_ref, bh_ref,
                  at_ref, bt_ref):
    # (hidden, in) @ (in, tile_b) -> (hidden, tile_b): batch on lanes / MXU wide side.
    h1 = jnp.dot(w1_ref[...], xt_ref[...],
                 precision=_HP, preferred_element_type=jnp.float32)
    h1 = jnp.maximum(h1 + b1_ref[...], 0.0)

    # (hidden, hidden) @ (hidden, tile_b) -> (hidden, tile_b)
    h2 = jnp.dot(w2_ref[...], h1,
                 precision=_HP, preferred_element_type=jnp.float32)
    h2 = jnp.maximum(h2 + b2_ref[...], 0.0)

    # Fused heads: (24, hidden) @ (hidden, tile_b) -> (24, tile_b).
    out = jnp.dot(wh_ref[...], h2,
                  precision=_HP, preferred_element_type=jnp.float32) + bh_ref[...]

    # Split at a sublane-aligned boundary (16 = 2 x 8) into two lane-dense stores.
    at_ref[...] = out[:A_WIDTH, :].astype(at_ref.dtype)
    bt_ref[...] = out[A_WIDTH:, :].astype(bt_ref.dtype)


@jax.jit
def mlp_ab_forward(x, params):
    """MLP_AB forward. x: (batch, input_size) f32. Returns A (batch,4,4), B (batch,4,2)."""
    batch, input_size = x.shape
    w1, b1 = params["w1"], params["b1"]     # torch layout: (out, in), (out,)
    w2, b2 = params["w2"], params["b2"]
    hidden = w1.shape[0]

    # Fuse the two heads once in the wrapper (tiny; XLA hoists/consts this).
    wh = jnp.concatenate([params["w3"], params["w4"]], axis=0)       # (24, hidden)
    bh = jnp.concatenate([params["b3"], params["b4"]], axis=0)       # (24,)
    b1c = b1.reshape(hidden, 1)
    b2c = b2.reshape(hidden, 1)
    bhc = bh.reshape(HEAD_WIDTH, 1)

    # --- batch tiling: lane-dim tiles (multiples of 128), minimal padding, and >=2 grid
    # steps whenever the batch spans >=2 lane blocks so v7x's 2 TCs both participate.
    padded_min = _round_up(batch, LANE)
    n_steps = _cdiv(padded_min, TILE_B_MAX)
    if n_steps > 1 and n_steps % 2:
        n_steps += 1                         # even step count balances v7x's two TCs
    elif n_steps == 1 and padded_min >= 2 * LANE:
        n_steps = 2                          # make sure the second TC isn't idle
    tile_b = _round_up(_cdiv(padded_min, n_steps), LANE)
    padded_batch = _round_up(padded_min, tile_b)
    grid = (padded_batch // tile_b,)

    # Transposed, lane-dense x stream: (input_size, padded_batch).
    xt = jnp.pad(x, ((0, padded_batch - batch), (0, 0))).T

    def resident(arr):   # grid-invariant block -> stays VMEM-resident across steps
        return pl.BlockSpec(arr.shape, lambda i: (0, 0))

    in_specs = [
        pl.BlockSpec((input_size, tile_b), lambda i: (0, i)),   # x^T tile (lane-dense)
        resident(w1), resident(b1c),
        resident(w2), resident(b2c),
        resident(wh), resident(bhc),
    ]
    out_specs = [
        pl.BlockSpec((A_WIDTH, tile_b), lambda i: (0, i)),      # A^T tile (lane-dense)
        pl.BlockSpec((B_WIDTH, tile_b), lambda i: (0, i)),      # B^T tile (lane-dense)
    ]
    out_shape = [
        jax.ShapeDtypeStruct((A_WIDTH, padded_batch), jnp.float32),
        jax.ShapeDtypeStruct((B_WIDTH, padded_batch), jnp.float32),
    ]

    flops = 2 * padded_batch * (input_size * hidden + hidden * hidden
                                + hidden * HEAD_WIDTH)
    weight_bytes = 4 * (hidden * input_size + hidden * hidden + HEAD_WIDTH * hidden
                        + 2 * hidden + HEAD_WIDTH)
    bytes_accessed = 4 * padded_batch * (input_size + HEAD_WIDTH) + weight_bytes

    at, bt = pl.pallas_call(
        mlp_ab_kernel,
        out_shape=out_shape,
        grid=grid,
        in_specs=in_specs,
        out_specs=out_specs,
        compiler_params=pltpu.CompilerParams(
            # Batch axis is embarrassingly parallel -> shards across v7x's 2 TensorCores;
            # harmless no-op on v5e/v6e.
            dimension_semantics=("parallel",),
        ),
        cost_estimate=pl.CostEstimate(
            flops=flops, bytes_accessed=bytes_accessed, transcendentals=0),
    )(xt, w1, b1c, w2, b2c, wh, bhc)

    # Back to the module's external layout (see caveat in header comment).
    A = at[:, :batch].T.reshape(batch, 4, 4)
    B = bt[:, :batch].T.reshape(batch, 4, 2)
    return A, B


def init_params(key, input_size, hidden_size):
    """Deterministic init mimicking torch's default Linear init
    (uniform in [-1/sqrt(fan_in), 1/sqrt(fan_in)]).  Torch layout: W (out, in), b (out,)."""
    def linear(key, fan_in, fan_out):
        kw, kb = jax.random.split(key)
        bound = 1.0 / jnp.sqrt(jnp.float32(fan_in))
        w = jax.random.uniform(kw, (fan_out, fan_in), jnp.float32, -bound, bound)
        b = jax.random.uniform(kb, (fan_out,), jnp.float32, -bound, bound)
        return w, b

    k1, k2, k3, k4 = jax.random.split(key, 4)
    w1, b1 = linear(k1, input_size, hidden_size)
    w2, b2 = linear(k2, hidden_size, hidden_size)
    w3, b3 = linear(k3, hidden_size, A_WIDTH)
    w4, b4 = linear(k4, hidden_size, B_WIDTH)
    return {"w1": w1, "b1": b1, "w2": w2, "b2": b2,
            "w3": w3, "b3": b3, "w4": w4, "b4": b4}


def reference(x, params):
    """Plain-JAX reference, same math as the PyTorch module (full-f32 matmuls)."""
    h1 = jnp.maximum(jnp.dot(x, params["w1"].T, precision=_HP) + params["b1"], 0.0)
    h2 = jnp.maximum(jnp.dot(h1, params["w2"].T, precision=_HP) + params["b2"], 0.0)
    A = (jnp.dot(h2, params["w3"].T, precision=_HP) + params["b3"]).reshape(-1, 4, 4)
    B = (jnp.dot(h2, params["w4"].T, precision=_HP) + params["b4"]).reshape(-1, 4, 2)
    return A, B


if __name__ == "__main__":
    input_size = 8
    hidden_size = 32
    batch = 8

    key = jax.random.PRNGKey(0)
    kx, kp = jax.random.split(key)
    x = jax.random.normal(kx, (batch, input_size), dtype=jnp.float32)
    params = init_params(kp, input_size, hidden_size)

    A, B = mlp_ab_forward(x, params)
    jax.block_until_ready((A, B))

    A_ref, B_ref = reference(x, params)
    assert A.shape == (batch, 4, 4) and B.shape == (batch, 4, 2)
    assert jnp.allclose(A, A_ref, atol=1e-5, rtol=1e-5)
    assert jnp.allclose(B, B_ref, atol=1e-5, rtol=1e-5)

    # Non-tile-aligned, multi-tile batch: exercises padding + the >=2-step (megacore) path.
    big_batch = 2052
    xb = jax.random.normal(kx, (big_batch, input_size), dtype=jnp.float32)
    Ab, Bb = mlp_ab_forward(xb, params)
    jax.block_until_ready((Ab, Bb))
    Ab_ref, Bb_ref = reference(xb, params)
    assert Ab.shape == (big_batch, 4, 4) and Bb.shape == (big_batch, 4, 2)
    assert jnp.allclose(Ab, Ab_ref, atol=1e-4, rtol=1e-4)
    assert jnp.allclose(Bb, Bb_ref, atol=1e-4, rtol=1e-4)

    print("KERNEL_OK")
</pallas_src>

<mosaic_0001>
module attributes {stable_mosaic.version = 11 : i64} {
  func.func @mlp_ab_kernel(%arg0: i32, %arg1: memref<8x128xf32, #tpu.memory_space<vmem>>, %arg2: memref<32x8xf32, #tpu.memory_space<vmem>>, %arg3: memref<32x1xf32, #tpu.memory_space<vmem>>, %arg4: memref<32x32xf32, #tpu.memory_space<vmem>>, %arg5: memref<32x1xf32, #tpu.memory_space<vmem>>, %arg6: memref<24x32xf32, #tpu.memory_space<vmem>>, %arg7: memref<24x1xf32, #tpu.memory_space<vmem>>, %arg8: memref<16x128xf32, #tpu.memory_space<vmem>>, %arg9: memref<8x128xf32, #tpu.memory_space<vmem>>) attributes {dimension_semantics = [#tpu.dimension_semantics<parallel>], iteration_bounds = array<i64: 1>, scalar_prefetch = 0 : i64, scratch_operands = 0 : i64, tpu.core_type = #tpu.core_type<tc>, window_params = [{transform_indices = @transform_0, window_bounds = array<i64: 8, 128>}, {pipeline_mode = #tpu.pipeline_mode<synchronous>, transform_indices = @transform_1, window_bounds = array<i64: 32, 8>}, {pipeline_mode = #tpu.pipeline_mode<synchronous>, transform_indices = @transform_2, window_bounds = array<i64: 32, 1>}, {pipeline_mode = #tpu.pipeline_mode<synchronous>, transform_indices = @transform_3, window_bounds = array<i64: 32, 32>}, {pipeline_mode = #tpu.pipeline_mode<synchronous>, transform_indices = @transform_4, window_bounds = array<i64: 32, 1>}, {pipeline_mode = #tpu.pipeline_mode<synchronous>, transform_indices = @transform_5, window_bounds = array<i64: 24, 32>}, {pipeline_mode = #tpu.pipeline_mode<synchronous>, transform_indices = @transform_6, window_bounds = array<i64: 24, 1>}, {transform_indices = @transform_7, window_bounds = array<i64: 16, 128>}, {transform_indices = @transform_8, window_bounds = array<i64: 8, 128>}]} {
    %c0 = arith.constant 0 : index
    %c0_0 = arith.constant 0 : index
    %0 = vector.load %arg2[%c0, %c0_0] : memref<32x8xf32, #tpu.memory_space<vmem>>, vector<32x8xf32>
    %c0_1 = arith.constant 0 : index
    %c0_2 = arith.constant 0 : index
    %1 = vector.load %arg1[%c0_1, %c0_2] : memref<8x128xf32, #tpu.memory_space<vmem>>, vector<8x128xf32>
    %cst = arith.constant dense<0.000000e+00> : vector<32x128xf32>
    %2 = tpu.matmul %0, %1, %cst {dimension_numbers = #tpu.dot_dimension_numbers<[1], [0], [0], [1], [0, 0, 1, 1], [], []>, precision = #tpu.contract_precision<fp32>} : vector<32x8xf32>, vector<8x128xf32>, vector<32x128xf32> -> vector<32x128xf32>
    %c0_3 = arith.constant 0 : index
    %c0_4 = arith.constant 0 : index
    %3 = vector.load %arg3[%c0_3, %c0_4] : memref<32x1xf32, #tpu.memory_space<vmem>>, vector<32x1xf32>
    %4 = vector.broadcast %3 : vector<32x1xf32> to vector<32x128xf32>
    %5 = arith.addf %2, %4 : vector<32x128xf32>
    %cst_5 = arith.constant 0.000000e+00 : f32
    %6 = vector.broadcast %cst_5 : f32 to vector<32x128xf32>
    %7 = arith.maximumf %5, %6 : vector<32x128xf32>
    %c0_6 = arith.constant 0 : index
    %c0_7 = arith.constant 0 : index
    %8 = vector.load %arg4[%c0_6, %c0_7] : memref<32x32xf32, #tpu.memory_space<vmem>>, vector<32x32xf32>
    %cst_8 = arith.constant dense<0.000000e+00> : vector<32x128xf32>
    %9 = tpu.matmul %8, %7, %cst_8 {dimension_numbers = #tpu.dot_dimension_numbers<[1], [0], [0], [1], [0, 0, 1, 1], [], []>, precision = #tpu.contract_precision<fp32>} : vector<32x32xf32>, vector<32x128xf32>, vector<32x128xf32> -> vector<32x128xf32>
    %c0_9 = arith.constant 0 : index
    %c0_10 = arith.constant 0 : index
    %10 = vector.load %arg5[%c0_9, %c0_10] : memref<32x1xf32, #tpu.memory_space<vmem>>, vector<32x1xf32>
    %11 = vector.broadcast %10 : vector<32x1xf32> to vector<32x128xf32>
    %12 = arith.addf %9, %11 : vector<32x128xf32>
    %cst_11 = arith.constant 0.000000e+00 : f32
    %13 = vector.broadcast %cst_11 : f32 to vector<32x128xf32>
    %14 = arith.maximumf %12, %13 : vector<32x128xf32>
    %c0_12 = arith.constant 0 : index
    %c0_13 = arith.constant 0 : index
    %15 = vector.load %arg6[%c0_12, %c0_13] : memref<24x32xf32, #tpu.memory_space<vmem>>, vector<24x32xf32>
    %cst_14 = arith.constant dense<0.000000e+00> : vector<24x128xf32>
    %16 = tpu.matmul %15, %14, %cst_14 {dimension_numbers = #tpu.dot_dimension_numbers<[1], [0], [0], [1], [0, 0, 1, 1], [], []>, precision = #tpu.contract_precision<fp32>} : vector<24x32xf32>, vector<32x128xf32>, vector<24x128xf32> -> vector<24x128xf32>
    %c0_15 = arith.constant 0 : index
    %c0_16 = arith.constant 0 : index
    %17 = vector.load %arg7[%c0_15, %c0_16] : memref<24x1xf32, #tpu.memory_space<vmem>>, vector<24x1xf32>
    %18 = vector.broadcast %17 : vector<24x1xf32> to vector<24x128xf32>
    %19 = arith.addf %16, %18 : vector<24x128xf32>
    %20 = vector.extract_strided_slice %19 {offsets = [0, 0], sizes = [16, 128], strides = [1, 1]} : vector<24x128xf32> to vector<16x128xf32>
    %c0_17 = arith.constant 0 : index
    %c0_18 = arith.constant 0 : index
    %21 = vector.load %arg8[%c0_17, %c0_18] : memref<16x128xf32, #tpu.memory_space<vmem>>, vector<16x128xf32>
    tpu.vector_store %arg8[%c0_17, %c0_18], %20 {strides = array<i32>} : memref<16x128xf32, #tpu.memory_space<vmem>>, vector<16x128xf32>,
    %22 = vector.extract_strided_slice %19 {offsets = [16, 0], sizes = [8, 128], strides = [1, 1]} : vector<24x128xf32> to vector<8x128xf32>
    %c0_19 = arith.constant 0 : index
    %c0_20 = arith.constant 0 : index
    %23 = vector.load %arg9[%c0_19, %c0_20] : memref<8x128xf32, #tpu.memory_space<vmem>>, vector<8x128xf32>
    tpu.vector_store %arg9[%c0_19, %c0_20], %22 {strides = array<i32>} : memref<8x128xf32, #tpu.memory_space<vmem>>, vector<8x128xf32>,
    return
  }
  func.func @transform_0(%arg0: i32) -> (i32, i32) {
    %c0_i32 = arith.constant 0 : i32
    %c0_i32_0 = arith.constant 0 : i32
    return %c0_i32, %arg0 : i32, i32
  }
  func.func @transform_1(%arg0: i32) -> (i32, i32) {
    %c0_i32 = arith.constant 0 : i32
    %c0_i32_0 = arith.constant 0 : i32
    %c0_i32_1 = arith.constant 0 : i32
    return %c0_i32, %c0_i32_0 : i32, i32
  }
  func.func @transform_2(%arg0: i32) -> (i32, i32) {
    %c0_i32 = arith.constant 0 : i32
    %c0_i32_0 = arith.constant 0 : i32
    %c0_i32_1 = arith.constant 0 : i32
    return %c0_i32, %c0_i32_0 : i32, i32
  }
  func.func @transform_3(%arg0: i32) -> (i32, i32) {
    %c0_i32 = arith.constant 0 : i32
    %c0_i32_0 = arith.constant 0 : i32
    %c0_i32_1 = arith.constant 0 : i32
    return %c0_i32, %c0_i32_0 : i32, i32
  }
  func.func @transform_4(%arg0: i32) -> (i32, i32) {
    %c0_i32 = arith.constant 0 : i32
    %c0_i32_0 = arith.constant 0 : i32
    %c0_i32_1 = arith.constant 0 : i32
    return %c0_i32, %c0_i32_0 : i32, i32
  }
  func.func @transform_5(%arg0: i32) -> (i32, i32) {
    %c0_i32 = arith.constant 0 : i32
    %c0_i32_0 = arith.constant 0 : i32
    %c0_i32_1 = arith.constant 0 : i32
    return %c0_i32, %c0_i32_0 : i32, i32
  }
  func.func @transform_6(%arg0: i32) -> (i32, i32) {
    %c0_i32 = arith.constant 0 : i32
    %c0_i32_0 = arith.constant 0 : i32
    %c0_i32_1 = arith.constant 0 : i32
    return %c0_i32, %c0_i32_0 : i32, i32
  }
  func.func @transform_7(%arg0: i32) -> (i32, i32) {
    %c0_i32 = arith.constant 0 : i32
    %c0_i32_0 = arith.constant 0 : i32
    return %c0_i32, %arg0 : i32, i32
  }
  func.func @transform_8(%arg0: i32) -> (i32, i32) {
    %c0_i32 = arith.constant 0 : i32
    %c0_i32_0 = arith.constant 0 : i32
    return %c0_i32, %arg0 : i32, i32
  }
}

</mosaic_0001>

<bundles_post_ra>
// kernel: mlp_ab_forward.1
= control target key start
LH: loop header
LB: loop body
LE: loop exit
PB: predicated region body
PF: predicated region fallthrough
CT: control target
= control target key end

     0   :  { %14 = vsyncpa [#allocation3], 0  ;;  %vm59_vm0 = vcmask 64512   ;;  %v2522_v8 = vmov 0   ;;  %s2869_s0 = inlined_call_operand.vmem [shape: f32[8,128], index: 0, kind: input, shape index: {}]   ;;  %s2870_s1 = inlined_call_operand.vmem [shape: f32[32,8], index: 1, kind: input, shape index: {}]   ;;  %s2871_s2 = inlined_call_operand.vmem [shape: f32[32,1], index: 2, kind: input, shape index: {}]   ;;  %s2872_s3 = inlined_call_operand.vmem [shape: f32[32,32], index: 3, kind: input, shape index: {}]   ;;  %s2873_s4 = inlined_call_operand.vmem [shape: f32[32,1], index: 4, kind: input, shape index: {}]   ;;  %s2874_s5 = inlined_call_operand.vmem [shape: f32[24,32], index: 5, kind: input, shape index: {}]   ;;  %s2875_s6 = inlined_call_operand.vmem [shape: f32[24,1], index: 6, kind: input, shape index: {}]   ;;  %s2876_s7 = inlined_call_operand.hbm [shape: f32[16,128], index: 7, kind: output, shape index: {0}]   ;;  %s2877_s8 = inlined_call_operand.hbm [shape: f32[8,128], index: 8, kind: output, shape index: {1}]  }
   0x1   :  { %v34_v0 = vld [vmem:[%s2869_s0] sm:$0xff]  ;;  %v31_v2 = vld [vmem:[%s2870_s1 + $0x8] sm:$0xff]  ;;  %v32_v6 = vld [vmem:[%s2870_s1 + $0x10] sm:$0xff]  ;;  %2472 = vset.pattern.permute.xlu0 %v2522_v8  ;;  %2473 = vset.pattern.permute.xlu1 %v2522_v8 }
   0x2   :  { %v30_v1 = vld [vmem:[%s2870_s1] sm:$0xff]  ;;  %v2584_v3 = vand.u32 4294901760, %v34_v0  ;;  %v64_v5 = vsel %vm59_vm0, %v31_v2, 0  ;;  %v33_v7 = vld [vmem:[%s2870_s1 + $0x18] sm:$0xff]  ;;  %v67_v12 = vsel %vm59_vm0, %v32_v6, 0  ;;  %v37_v14 = vld [vmem:[%s2871_s2 + $0x10] sm:$0xff] }
   0x3   :  { %v61_v4 = vsel %vm59_vm0, %v30_v1, 0  ;;  %v35_v9 = vld [vmem:[%s2871_s2] sm:$0xff]  ;;  %v2597_v11 = vand.u32 4294901760, %v64_v5  ;;  %v70_v13 = vsel %vm59_vm0, %v33_v7, 0  ;;  %v2603_v16 = vand.u32 4294901760, %v67_v12  ;;  %v36_v17 = vld [vmem:[%s2871_s2 + $0x8] sm:$0xff]  ;;  %51 = vperm.xlu1 %2473, %v37_v14  }
   0x4   :  { %v2595_v10 = vand.u32 4294901760, %v61_v4  ;;  %41 = vperm.xlu0 %2472, %v35_v9   ;;  %v180_v15 = vsub.f32 %v34_v0, %v2584_v3  ;;  %2064 = vmatprep.subr.mxu1 %v2584_v3  ;;  %v38_v20 = vld [vmem:[%s2871_s2 + $0x18] sm:$0xff]  ;;  %v2616_v22 = vand.u32 4294901760, %v70_v13 }
   0x5   :  { %v149_v18 = vsub.f32 %v64_v5, %v2597_v11  ;;  %2065 = vmatpush3.msra.mxu1 %v2584_v3  ;;  %v159_v23 = vsub.f32 %v67_v12, %v2603_v16 }
   0x6   :  { %2074 = vmatprep.mubr.f32.mxu0 %v2595_v10  ;;  %v139_v19 = vsub.f32 %v61_v4, %v2595_v10  ;;  %v181_v21 = vand.u32 4294901760, %v180_v15 }
   0x7   :  { %15 = vsyncpa [#allocation5], 0  ;;  %v150_v25 = vand.u32 4294901760, %v149_v18  ;;  %v169_v27 = vsub.f32 %v70_v13, %v2616_v22  ;;  %v160_v28 = vand.u32 4294901760, %v159_v23  ;;  %v655_v29 = vld [vmem:[%s2873_s4] sm:$0xff]  ;;  %56 = vperm.xlu1 %2473, %v38_v20   ;;  %v656_v32 = vld [vmem:[%s2873_s4 + $0x8] sm:$0xff] }
   0x8   :  { %v140_v24 = vand.u32 4294901760, %v139_v19  ;;  %46 = vperm.xlu0 %2472, %v36_v17   ;;  %v182_v26 = vsub.f32 %v180_v15, %v181_v21  ;;  %v657_v40 = vld [vmem:[%s2873_s4 + $0x10] sm:$0xff]  ;;  %v658_v41 = vld [vmem:[%s2873_s4 + $0x18] sm:$0xff]  ;;  %v1313_v43 = vld [vmem:[%s2875_s6] sm:$0xff]  ;;  %vm679_vm1 = vcmask 261120   ;;  %vm2524_vm2 = vmmov 0  }
   0x9   :  { %v151_v31 = vsub.f32 %v149_v18, %v150_v25  ;;  %v170_v34 = vand.u32 4294901760, %v169_v27  ;;  %v161_v35 = vsub.f32 %v159_v23, %v160_v28  ;;  %v1314_v44 = vld [vmem:[%s2875_s6 + $0x8] sm:$0xff]  ;;  %v1315_v45 = vld [vmem:[%s2875_s6 + $0x10] sm:$0xff]  ;;  %v651_v46 = vld [vmem:[%s2872_s3] sm:$0xff]  ;;  %s2527_s22 = smov [#allocation4]  }
   0xa   :  { %v141_v30 = vsub.f32 %v139_v19, %v140_v24  ;;  %v183_v33 = vand.u32 4294901760, %v182_v26  ;;  %v681_v47 = vsel %vm679_vm1, %v651_v46, 0  ;;  %v652_v57 = vld [vmem:[%s2872_s3 + $0x8] sm:$0xff]  ;;  %v653_v59 = vld [vmem:[%s2872_s3 + $0x10] sm:$0xff]  ;;  %v654_v63 = vld [vmem:[%s2872_s3 + $0x18] sm:$0xff]  ;;  %s1932_s2 = sshll.u32 %s2527_s22, 4  ;;  %s1933_s2 = int_to_ptr.vmem [resolvable:$true] %s1932_s2 }
   0xb   :  { %v152_v37 = vand.u32 4294901760, %v151_v31  ;;  %v171_v38 = vsub.f32 %v169_v27, %v170_v34  ;;  %666 = vperm.xlu1 %2473, %v656_v32   ;;  %v162_v39 = vand.u32 4294901760, %v161_v35  ;;  %v2660_v48 = vand.u32 4294901760, %v681_v47 }
   0xc   :  { %v142_v36 = vand.u32 4294901760, %v141_v30  ;;  %661 = vperm.xlu0 %2472, %v655_v29   ;;  %2072 = vmatprep.subr.mxu0 %v183_v33  ;;  %v684_v60 = vsel %vm679_vm1, %v652_v57, 0  ;;  %v687_v62 = vsel %vm679_vm1, %v653_v59, 0  ;;  %v690_v4 = vsel %vm679_vm1, %v654_v63, 0 }
   0xd   :  { %2073 = vmatpush3.msra.mxu0 %v183_v33  ;;  %v172_v42 = vand.u32 4294901760, %v171_v38  ;;  %v2663_v49 = vsub.f32 %v681_v47, %v2660_v48  ;;  %v2680_v0 = vand.u32 4294901760, %v684_v60  ;;  %v2688_v12 = vand.u32 4294901760, %v690_v4 }
   0xe   :  { %2066 = vmatprep.mubr.f32.mxu1 %v142_v36  ;;  %2075 = vmatmul.mubr.f32.vlgmr.msra.gmra.mrb[0].mxu0 %v2597_v11 }
   0xf   :  { %2080 = vmatprep.subr.mxu0 %v180_v15  ;;  %2077 = vmatprep.mubr.f32.mxu0 %v2603_v16  ;;  %v763_v50 = vand.u32 4294901760, %v2663_v49  ;;  %v2686_v9 = vsub.f32 %v684_v60, %v2680_v0 }
  0x10   :  { %2081 = vmatpush3.msra.mxu0 %v180_v15  ;;  %2067 = vmatmul.mubr.f32.vlgmr.msra.gmra.mrb[0].mxu1 %v152_v37 }
  0x11   :  { %2088 = vmatprep.subr.mxu0 %v2584_v3  ;;  %2069 = vmatprep.mubr.f32.mxu1 %v162_v39  ;;  %v764_v51 = vsub.f32 %v2663_v49, %v763_v50 }
  0x12   :  { %671 = vperm.xlu0 %2472, %v657_v40   ;;  %2078 = vmatmul.mubr.f32.gmra.mrb[2].mxu0 %v2616_v22 }
  0x13   :  { %676 = vperm.xlu1 %2473, %v658_v41   ;;  %2082 = vmatprep.mubr.f32.mxu0 %v139_v19  ;;  %v765_v52 = vand.u32 4294901760, %v764_v51 }
  0x14   :  { %2070 = vmatmul.mubr.f32.gmra.mrb[2].mxu1 %v172_v42 }
  0x15   :  { %2120 = vmatprep.mubr.f32.mxu1 %v765_v52 }
  0x16   :  { %1318 = vperm.xlu0 %2472, %v1313_v43   ;;  %2083 = vmatmul.mubr.f32.vlgmr.msra.gmra.mrb[0].mxu0 %v149_v18 }
  0x17   :  { %1323 = vperm.xlu1 %2473, %v1314_v44   ;;  %2089 = vmatpush3.msra.mxu0 %v2584_v3 }
  0x18   :  { %2085 = vmatprep.mubr.f32.mxu0 %v159_v23  ;;  %2096 = vmatprep.subr.mxu0 %v181_v21 }
  0x1a   :  { %1328 = vperm.xlu0 %2472, %v1315_v45   ;;  %2086 = vmatmul.mubr.f32.gmra.mrb[2].mxu0 %v169_v27 }
  0x1b   :  { %2090 = vmatprep.mubr.f32.mxu0 %v140_v24 }
  0x1e   :  { %2091 = vmatmul.mubr.f32.vlgmr.msra.gmra.mrb[0].mxu0 %v150_v25  ;;  %v2695_v25 = vsub.f32 %v690_v4, %v2688_v12 }
  0x1f   :  { %2097 = vmatpush3.msra.mxu0 %v181_v21  ;;  %2093 = vmatprep.mubr.f32.mxu0 %v160_v28 }
  0x20   :  { %2104 = vmatprep.subr.mxu0 %v2584_v3  ;;  %v793_v37 = vand.u32 4294901760, %v2695_v25 }
  0x22   :  { %2094 = vmatmul.mubr.f32.gmra.mrb[2].mxu0 %v170_v34 }
  0x23   :  { %2098 = vmatprep.mubr.f32.mxu0 %v2595_v10 }
  0x26   :  { %2099 = vmatmul.mubr.f32.vlgmr.msra.gmra.mrb[0].mxu0 %v2597_v11 }
  0x27   :  { %2105 = vmatpush3.msra.mxu0 %v2584_v3  ;;  %2101 = vmatprep.mubr.f32.mxu0 %v2603_v16  ;;  %v2682_v3 = vand.u32 4294901760, %v687_v62 }
  0x29   :  { %v2691_v15 = vsub.f32 %v687_v62, %v2682_v3 }
  0x2a   :  { %2102 = vmatmul.mubr.f32.gmra.mrb[2].mxu0 %v2616_v22 }
  0x2b   :  { %2106 = vmatprep.mubr.f32.mxu0 %v2595_v10  ;;  %v783_v28 = vand.u32 4294901760, %v2691_v15 }
  0x2d   :  { %v784_v41 = vsub.f32 %v2691_v15, %v783_v28 }
  0x2e   :  { %2107 = vmatmul.mubr.f32.vlgmr.msra.gmra.mrb[0].mxu0 %v2597_v11 }
  0x2f   :  { %2109 = vmatprep.mubr.f32.mxu0 %v2603_v16 }
  0x32   :  { %2110 = vmatmul.mubr.f32.gmra.mrb[2].mxu0 %v2616_v22  ;;  %v773_v22 = vand.u32 4294901760, %v2686_v9 }
  0x34   :  { %v774_v34 = vsub.f32 %v2686_v9, %v773_v22 }
  0x36   :  { %v775_v47 = vand.u32 4294901760, %v774_v34 }
  0x82   :  { %v52_v61 = vpop.permute.xlu1 %51 }
  0x83   :  { %v42_v58 = vpop.permute.xlu0 %41 }
  0x86   :  { %v57_v10 = vpop.permute.xlu1 %56 }
  0x87   :  { %v47_v1 = vpop.permute.xlu0 %46 }
  0x8a   :  { %v667_v4 = vpop.permute.xlu1 %666 }
  0xe3   :  { %v2068_v53 = vpop.f32.mrb[0].mxu1 }
  0xe4   :  { %v144_v54 = vpop.f32.mrb[1].mxu1  ;;  %v155_v2 = vadd.f32 %v2068_v53, %v47_v1 }
  0xe5   :  { %v145_v5 = vadd.f32 %v144_v54, %v42_v58  ;;  %v794_v54 = vsub.f32 %v2695_v25, %v793_v37 }
  0xe7   :  { %v2071_v55 = vpop.f32.mrb[2].mxu1  ;;  %v795_v62 = vand.u32 4294901760, %v794_v54 }
  0xe8   :  { %v164_v56 = vpop.f32.mrb[3].mxu1  ;;  %v175_v13 = vadd.f32 %v2071_v55, %v57_v10 }
  0xe9   :  { %v165_v16 = vadd.f32 %v164_v56, %v52_v61  ;;  %v785_v56 = vand.u32 4294901760, %v784_v41 }
 0x101   :  { %v2108_v6 = vpop.f32.mrb[0].mxu0 }
 0x102   :  { %v2387_v7 = vadd.f32 %v2108_v6, %v155_v2  ;;  %v625_v8 = vpop.f32.mrb[1].mxu0  ;;  %v662_v6 = vpop.permute.xlu0 %661 }
 0x103   :  { %v2389_v11 = vadd.f32 %v625_v8, %v145_v5  ;;  %v1312_v8 = vld [vmem:[%s2874_s5 + $0x10] sm:$0xff] }
 0x104   :  { %v648_v14 = vmax.f32 %v2387_v7, 0.0 }
 0x105   :  { %v647_v17 = vmax.f32 %v2389_v11, 0.0  ;;  %v2111_v18 = vpop.f32.mrb[2].mxu0 }
 0x106   :  { %v696_v19 = vand.u32 4294901760, %v648_v14  ;;  %v2391_v20 = vadd.f32 %v2111_v18, %v175_v13  ;;  %v637_v21 = vpop.f32.mrb[3].mxu0 }
 0x107   :  { %v693_v23 = vand.u32 4294901760, %v647_v17  ;;  %v2393_v24 = vadd.f32 %v637_v21, %v165_v16 }
 0x108   :  { %v810_v26 = vsub.f32 %v648_v14, %v696_v19  ;;  %v650_v27 = vmax.f32 %v2391_v20, 0.0  ;;  %v1338_v14 = vsel %vm679_vm1, %v1312_v8, 0  ;;  %v672_v20 = vpop.permute.xlu0 %671 }
 0x109   :  { %v2698_v29 = vpack.c.bf16 %v696_v19, %v693_v23  ;;  %v803_v30 = vsub.f32 %v647_v17, %v693_v23  ;;  %v649_v31 = vmax.f32 %v2393_v24, 0.0  ;;  %v677_v17 = vpop.permute.xlu1 %676 }
 0x10a   :  { %v811_v32 = vand.u32 4294901760, %v810_v26  ;;  %v702_v33 = vand.u32 4294901760, %v650_v27 }
 0x10b   :  { %v804_v35 = vand.u32 4294901760, %v803_v30  ;;  %v699_v36 = vand.u32 4294901760, %v649_v31  ;;  %2299 = vmatprep.subr.bf16.mxu1 %v2698_v29  ;;  %v2314_v38 = vpack.c.bf16 %v810_v26, %v803_v30 }
 0x10c   :  { %v824_v39 = vsub.f32 %v650_v27, %v702_v33  ;;  %2301 = vmatpush3.bf16.msra.mxu1 %v2698_v29  ;;  %v812_v40 = vsub.f32 %v810_v26, %v811_v32 }
 0x10d   :  { %v2302_v42 = vpack.c.bf16 %v702_v33, %v699_v36  ;;  %v817_v43 = vsub.f32 %v649_v31, %v699_v36  ;;  %v805_v44 = vsub.f32 %v803_v30, %v804_v35  ;;  %v2330_v45 = vpack.c.bf16 %v811_v32, %v804_v35 }
 0x10e   :  { %v825_v46 = vand.u32 4294901760, %v824_v39  ;;  %v813_v51 = vand.u32 4294901760, %v812_v40 }
 0x10f   :  { %v818_v52 = vand.u32 4294901760, %v817_v43  ;;  %2303 = vmatprep.subr.bf16.mxu1 %v2302_v42  ;;  %v806_v53 = vand.u32 4294901760, %v805_v44  ;;  %v2318_v55 = vpack.c.bf16 %v824_v39, %v817_v43 }
 0x110   :  { %2305 = vmatpush3.bf16.msra.mxu1 %v2302_v42  ;;  %v826_v57 = vsub.f32 %v824_v39, %v825_v46 }
 0x111   :  { %v2306_v58 = vpack.c.bf16 %v813_v51, %v806_v53  ;;  %v819_v59 = vsub.f32 %v817_v43, %v818_v52  ;;  %v2334_v60 = vpack.c.bf16 %v825_v46, %v818_v52 }
 0x112   :  { %v827_v61 = vand.u32 4294901760, %v826_v57 }
 0x113   :  { %2121 = vmatmul.mubr.f32.vlgmr.msra.gmra.mrb[4].mxu1 %v775_v47  ;;  %2307 = vmatprep.subr.bf16.mxu1 %v2306_v58  ;;  %v820_v63 = vand.u32 4294901760, %v819_v59 }
 0x114   :  { %2309 = vmatpush3.bf16.msra.mxu1 %v2306_v58  ;;  %2123 = vmatprep.mubr.f32.mxu1 %v785_v56 }
 0x115   :  { %v2310_v1 = vpack.c.bf16 %v827_v61, %v820_v63 }
 0x117   :  { %2124 = vmatmul.mubr.f32.gmra.mrb[6].mxu1 %v795_v62  ;;  %2311 = vmatprep.subr.bf16.mxu1 %v2310_v1 }
 0x118   :  { %2313 = vmatpush3.bf16.msra.mxu1 %v2310_v1  ;;  %2134 = vmatprep.mubr.f32.mxu1 %v2660_v48 }
 0x119   :  { %2315 = vmatprep.subr.bf16.mxu1 %v2314_v38 }
 0x11b   :  { %2135 = vmatmul.mubr.f32.vlgmr.msra.gmra.mrb[4].mxu1 %v2680_v0 }
 0x11c   :  { %2317 = vmatpush3.bf16.msra.mxu1 %v2314_v38  ;;  %2137 = vmatprep.mubr.f32.mxu1 %v2682_v3 }
 0x11d   :  { %2319 = vmatprep.subr.bf16.mxu1 %v2318_v55 }
 0x11f   :  { %2138 = vmatmul.mubr.f32.gmra.mrb[6].mxu1 %v2688_v12 }
 0x120   :  { %2321 = vmatpush3.bf16.msra.mxu1 %v2318_v55  ;;  %2148 = vmatprep.mubr.f32.mxu1 %v2663_v49  ;;  %v2523_v49 = vmov 0.0|0.0  }
 0x121   :  { %2323 = vmatprep.subr.bf16.mxu1 %v2698_v29  ;;  %2358 = vmatprep.subr.bf16.mxu0 %v2523_v49 }
 0x123   :  { %2149 = vmatmul.mubr.f32.vlgmr.msra.gmra.mrb[4].mxu1 %v2686_v9 }
 0x124   :  { %2325 = vmatpush3.bf16.msra.mxu1 %v2698_v29  ;;  %2151 = vmatprep.mubr.f32.mxu1 %v2691_v15 }
 0x125   :  { %2327 = vmatprep.subr.bf16.mxu1 %v2302_v42 }
 0x127   :  { %2152 = vmatmul.mubr.f32.gmra.mrb[6].mxu1 %v2695_v25  ;;  %v2765_v25 = vand.u32 4294901760, %v1338_v14 }
 0x128   :  { %2329 = vmatpush3.bf16.msra.mxu1 %v2302_v42  ;;  %2162 = vmatprep.mubr.f32.mxu1 %v763_v50  ;;  %v2525_v50 = vmov 0.0  }
 0x129   :  { %2331 = vmatprep.subr.bf16.mxu1 %v2330_v45  ;;  %2238 = vmatprep.mubr.msk.f32.mxu0 %vm2524_vm2, %v2525_v50 }
 0x12b   :  { %2163 = vmatmul.mubr.f32.vlgmr.msra.gmra.mrb[4].mxu1 %v773_v22 }
 0x12c   :  { %2333 = vmatpush3.bf16.msra.mxu1 %v2330_v45  ;;  %2165 = vmatprep.mubr.f32.mxu1 %v783_v28 }
 0x12d   :  { %2335 = vmatprep.subr.bf16.mxu1 %v2334_v60 }
 0x12f   :  { %2166 = vmatmul.mubr.f32.gmra.mrb[6].mxu1 %v793_v37  ;;  %v2774_v37 = vsub.f32 %v1338_v14, %v2765_v25  ;;  %v1324_v14 = vpop.permute.xlu1 %1323 }
 0x130   :  { %2337 = vmatpush3.bf16.msra.mxu1 %v2334_v60  ;;  %2176 = vmatprep.mubr.f32.mxu1 %v2660_v48 }
 0x131   :  { %2339 = vmatprep.subr.bf16.mxu1 %v2698_v29  ;;  %v1431_v54 = vand.u32 4294901760, %v2774_v37 }
 0x133   :  { %2177 = vmatmul.mubr.f32.vlgmr.msra.gmra.mrb[4].mxu1 %v2680_v0  ;;  %v1432_v1 = vsub.f32 %v2774_v37, %v1431_v54 }
 0x134   :  { %2341 = vmatpush3.bf16.msra.mxu1 %v2698_v29  ;;  %2179 = vmatprep.mubr.f32.mxu1 %v2682_v3 }
 0x135   :  { %2343 = vmatprep.subr.bf16.mxu1 %v2302_v42 }
 0x137   :  { %2180 = vmatmul.mubr.f32.gmra.mrb[6].mxu1 %v2688_v12 }
 0x138   :  { %2345 = vmatpush3.bf16.msra.mxu1 %v2302_v42  ;;  %2190 = vmatprep.mubr.f32.mxu1 %v2660_v48  ;;  %v1310_v48 = vld [vmem:[%s2874_s5] sm:$0xff] }
 0x139   :  { %2346 = vmatprep.subr.bf16.mxu1 %v2523_v49 }
 0x13b   :  { %2191 = vmatmul.mubr.f32.vlgmr.msra.gmra.mrb[4].mxu1 %v2680_v0  ;;  %v1332_v0 = vsel %vm679_vm1, %v1310_v48, 0 }
 0x13c   :  { %2193 = vmatprep.mubr.f32.mxu1 %v2682_v3  ;;  %v2746_v2 = vand.u32 4294901760, %v1332_v0  ;;  %v1311_v3 = vld [vmem:[%s2874_s5 + $0x8] sm:$0xff]  ;;  %s2526_s5 = smov [#allocation2]  }
 0x13d   :  { %v1335_v5 = vsel %vm679_vm1, %v1311_v3, 0  ;;  %v1433_v3 = vand.u32 4294901760, %v1432_v1  ;;  %s1919_s21 = sshll.u32 %s2526_s5, 4  ;;  %s1920_s21 = int_to_ptr.vmem [resolvable:$true] %s1919_s21 }
 0x13e   :  { %v2753_v7 = vsub.f32 %v1332_v0, %v2746_v2  ;;  %s2474_s23 = scalar_lea.vmem %s1920_s21, 256  ;;  %p2479_p1 = scmp.lt.s32.totalorder %s1920_s21, %s1920_s21 }
 0x13f   :  { %2194 = vmatmul.mubr.f32.gmra.mrb[6].mxu1 %v2688_v12  ;;  %v2758_v12 = vand.u32 4294901760, %v1335_v5  ;;  %p2475_p0 = scmp.ne.s32.totalorder %s1920_s21, %s2474_s23  ;;  %p2480_p2 = scmp.lt.s32.totalorder %s2474_s23, %s2474_s23 }
 0x140   :  { %2204 = vmatprep.mubr.msk.f32.mxu1 %vm2524_vm2, %v2525_v50  ;;  %v1411_v16 = vand.u32 4294901760, %v2753_v7 }
 0x141   :  { %v2763_v24 = vsub.f32 %v1335_v5, %v2758_v12  ;;  %p2481_p3 = por %p2480_p2, %p2479_p1 }
 0x142   :  { %v1412_v30 = vsub.f32 %v2753_v7, %v1411_v16 }
 0x143   :  { %v1421_v36 = vand.u32 4294901760, %v2763_v24  ;;  %p2482_p4 = pnand %p2481_p3, %p2475_p0 }
 0x144   :  { %v1413_v43 = vand.u32 4294901760, %v1412_v30 }
 0x145   :  { %v1422_v53 = vsub.f32 %v2763_v24, %v1421_v36 }
 0x147   :  { %v1423_v63 = vand.u32 4294901760, %v1422_v53 }
 0x20e   :  { %v2192_v9 = vpop.f32.mrb[4].mxu1 }
 0x20f   :  { %v2394_v10 = vadd.f32 %v2192_v9, %v667_v4  ;;  %v1284_v11 = vpop.f32.mrb[5].mxu1  ;;  %v1319_v9 = vpop.permute.xlu0 %1318 }
 0x210   :  { %v2395_v13 = vadd.f32 %v1284_v11, %v662_v6 }
 0x211   :  { %v1307_v15 = vmax.f32 %v2394_v10, 0.0 }
 0x212   :  { %v1306_v18 = vmax.f32 %v2395_v13, 0.0  ;;  %v2195_v19 = vpop.f32.mrb[6].mxu1 }
 0x213   :  { %v1344_v21 = vand.u32 4294901760, %v1307_v15  ;;  %v2396_v22 = vadd.f32 %v2195_v19, %v677_v17  ;;  %v1296_v23 = vpop.f32.mrb[7].mxu1  ;;  %v1329_v17 = vpop.permute.xlu0 %1328 }
 0x214   :  { %v1341_v26 = vand.u32 4294901760, %v1306_v18  ;;  %v2397_v27 = vadd.f32 %v1296_v23, %v672_v20 }
 0x215   :  { %v1448_v28 = vsub.f32 %v1307_v15, %v1344_v21  ;;  %v1309_v29 = vmax.f32 %v2396_v22, 0.0 }
 0x216   :  { %v2770_v31 = vpack.c.bf16 %v1344_v21, %v1341_v26  ;;  %v1441_v32 = vsub.f32 %v1306_v18, %v1341_v26  ;;  %v1308_v33 = vmax.f32 %v2397_v27, 0.0 }
 0x217   :  { %v1449_v34 = vand.u32 4294901760, %v1448_v28  ;;  %v1350_v35 = vand.u32 4294901760, %v1309_v29 }
 0x218   :  { %v1442_v38 = vand.u32 4294901760, %v1441_v32  ;;  %v1347_v39 = vand.u32 4294901760, %v1308_v33  ;;  %2348 = vmatpush3.bf16.msra.mxu1 %v2770_v31  ;;  %v2359_v40 = vpack.c.bf16 %v1448_v28, %v1441_v32 }
 0x219   :  { %v1450_v41 = vsub.f32 %v1448_v28, %v1449_v34  ;;  %v1462_v42 = vsub.f32 %v1309_v29, %v1350_v35  ;;  %2349 = vmatprep.subr.bf16.mxu1 %v2523_v49 }
 0x21a   :  { %v1443_v44 = vsub.f32 %v1441_v32, %v1442_v38  ;;  %v2778_v45 = vpack.c.bf16 %v1350_v35, %v1347_v39  ;;  %v1455_v46 = vsub.f32 %v1308_v33, %v1347_v39  ;;  %2360 = vmatpush3.bf16.msra.mxu0 %v2359_v40  ;;  %v2371_v47 = vpack.c.bf16 %v1449_v34, %v1442_v38 }
 0x21b   :  { %v1451_v51 = vand.u32 4294901760, %v1450_v41  ;;  %v1463_v52 = vand.u32 4294901760, %v1462_v42  ;;  %2361 = vmatprep.subr.bf16.mxu0 %v2523_v49 }
 0x21c   :  { %v1444_v55 = vand.u32 4294901760, %v1443_v44  ;;  %v1456_v56 = vand.u32 4294901760, %v1455_v46  ;;  %2351 = vmatpush3.bf16.msra.mxu1 %v2778_v45  ;;  %v2362_v57 = vpack.c.bf16 %v1462_v42, %v1455_v46 }
 0x21d   :  { %v1464_v58 = vsub.f32 %v1462_v42, %v1463_v52  ;;  %2352 = vmatprep.subr.bf16.mxu1 %v2523_v49 }
 0x21e   :  { %v1457_v59 = vsub.f32 %v1455_v46, %v1456_v56  ;;  %2363 = vmatpush3.bf16.msra.mxu0 %v2362_v57  ;;  %v2353_v60 = vpack.c.bf16 %v1451_v51, %v1444_v55  ;;  %v2374_v61 = vpack.c.bf16 %v1463_v52, %v1456_v56 }
 0x21f   :  { %v1465_v62 = vand.u32 4294901760, %v1464_v58  ;;  %2205 = vmatmul.mubr.f32.vlgmr.msra.gmra.mrb[8].mxu1 %v1413_v43  ;;  %2364 = vmatprep.subr.bf16.mxu0 %v2523_v49 }
 0x220   :  { %v1458_v48 = vand.u32 4294901760, %v1457_v59  ;;  %2354 = vmatpush3.bf16.msra.mxu1 %v2353_v60  ;;  %2207 = vmatprep.mubr.msk.f32.mxu1 %vm2524_vm2, %v2525_v50 }
 0x221   :  { %2239 = vmatmul.mubr.f32.vlgmr.msra.gmra.mrb[4].mxu0 %v2753_v7  ;;  %2355 = vmatprep.subr.bf16.mxu1 %v2523_v49 }
 0x222   :  { %2366 = vmatpush3.bf16.msra.mxu0 %v2770_v31  ;;  %v2356_v0 = vpack.c.bf16 %v1465_v62, %v1458_v48  ;;  %2241 = vmatprep.mubr.msk.f32.mxu0 %vm2524_vm2, %v2525_v50 }
 0x223   :  { %2208 = vmatmul.mubr.f32.gmra.mrb[10].mxu1 %v1423_v63  ;;  %2367 = vmatprep.subr.bf16.mxu0 %v2523_v49 }
 0x224   :  { %2357 = vmatpush3.bf16.msra.mxu1 %v2356_v0  ;;  %2210 = vmatprep.mubr.msk.f32.mxu1 %vm2524_vm2, %v2525_v50 }
 0x225   :  { %2242 = vmatmul.mubr.f32.gmra.mrb[6].mxu0 %v2763_v24  ;;  %2382 = vmatprep.subr.bf16.mxu1 %v2523_v49 }
 0x226   :  { %2369 = vmatpush3.bf16.msra.mxu0 %v2778_v45  ;;  %2255 = vmatprep.mubr.msk.f32.mxu0 %vm2524_vm2, %v2525_v50 }
 0x227   :  { %2211 = vmatmul.mubr.f32.gmra.mrb[12].mxu1 %v1433_v3  ;;  %2370 = vmatprep.subr.bf16.mxu0 %v2523_v49 }
 0x228   :  { %2221 = vmatprep.mubr.msk.f32.mxu1 %vm2524_vm2, %v2525_v50 }
 0x229   :  { %2256 = vmatmul.mubr.f32.vlgmr.msra.gmra.mrb[4].mxu0 %v1411_v16 }
 0x22a   :  { %2372 = vmatpush3.bf16.msra.mxu0 %v2371_v47  ;;  %2258 = vmatprep.mubr.msk.f32.mxu0 %vm2524_vm2, %v2525_v50 }
 0x22b   :  { %2222 = vmatmul.mubr.f32.vlgmr.msra.gmra.mrb[8].mxu1 %v2746_v2  ;;  %2373 = vmatprep.subr.bf16.mxu0 %v2523_v49 }
 0x22c   :  { %2384 = vmatpush3.bf16.msra.mxu1 %v2359_v40  ;;  %2224 = vmatprep.mubr.msk.f32.mxu1 %vm2524_vm2, %v2525_v50 }
 0x22d   :  { %2259 = vmatmul.mubr.f32.gmra.mrb[6].mxu0 %v1421_v36  ;;  %2383 = vmatprep.subr.bf16.mxu1 %v2523_v49 }
 0x22e   :  { %2375 = vmatpush3.bf16.msra.mxu0 %v2374_v61  ;;  %2261 = vmatprep.mubr.msk.f32.mxu0 %vm2524_vm2, %v2525_v50 }
 0x22f   :  { %2225 = vmatmul.mubr.f32.gmra.mrb[10].mxu1 %v2758_v12  ;;  %2376 = vmatprep.subr.bf16.mxu0 %v2523_v49 }
 0x230   :  { %2385 = vmatpush3.bf16.msra.mxu1 %v2362_v57  ;;  %2227 = vmatprep.mubr.msk.f32.mxu1 %vm2524_vm2, %v2525_v50 }
 0x231   :  { %2262 = vmatmul.mubr.f32.gmra.mrb[8].mxu0 %v1431_v54 }
 0x232   :  { %2272 = vmatprep.mubr.msk.f32.mxu0 %vm2524_vm2, %v2525_v50 }
 0x233   :  { %2228 = vmatmul.mubr.f32.gmra.mrb[12].mxu1 %v2765_v25 }
 0x234   :  { %2244 = vmatprep.mubr.msk.f32.mxu1 %vm2524_vm2, %v2525_v50 }
 0x235   :  { %2273 = vmatmul.mubr.f32.vlgmr.msra.gmra.mrb[4].mxu0 %v2746_v2 }
 0x236   :  { %2378 = vmatpush3.bf16.msra.mxu0 %v2770_v31  ;;  %2275 = vmatprep.mubr.msk.f32.mxu0 %vm2524_vm2, %v2525_v50 }
 0x237   :  { %2379 = vmatprep.subr.bf16.mxu0 %v2523_v49 }
 0x239   :  { %2276 = vmatmul.mubr.f32.gmra.mrb[6].mxu0 %v2758_v12 }
 0x23a   :  { %2381 = vmatpush3.bf16.msra.mxu0 %v2778_v45  ;;  %2278 = vmatprep.mubr.msk.f32.mxu0 %vm2524_vm2, %v2525_v50 }
 0x23b   :  { %2245 = vmatmul.mubr.f32.vlgmr.msra.gmra.mrb[12].mxu1 %v2774_v37 }
 0x23d   :  { %2279 = vmatmul.mubr.f32.gmra.mrb[8].mxu0 %v2765_v25 }
 0x23e   :  { %2289 = vmatprep.mubr.msk.f32.mxu0 %vm2524_vm2, %v2525_v50 }
 0x241   :  { %2290 = vmatmul.mubr.f32.vlgmr.msra.gmra.mrb[4].mxu0 %v2746_v2 }
 0x242   :  { %2292 = vmatprep.mubr.msk.f32.mxu0 %vm2524_vm2, %v2525_v50 }
 0x245   :  { %2293 = vmatmul.mubr.f32.gmra.mrb[6].mxu0 %v2758_v12 }
 0x246   :  { %2295 = vmatprep.mubr.msk.f32.mxu0 %vm2524_vm2, %v2525_v50 }
 0x249   :  { %2296 = vmatmul.mubr.f32.gmra.mrb[8].mxu0 %v2765_v25 }
 0x2fe   :  { %v1526_v49 = vpop.f32.mrb[8].mxu1 }
 0x2ff   :  { %v2223_v4 = vpop.f32.mrb[9].mxu1  ;;  %v2398_v10 = vadd.f32 %v1526_v49, %v1319_v9 }
 0x302   :  { %v1532_v5 = vpop.f32.mrb[10].mxu1 }
 0x303   :  { %v2226_v6 = vpop.f32.mrb[11].mxu1  ;;  %v2400_v12 = vadd.f32 %v1532_v5, %v1324_v14 }
 0x30e   :  { %v1632_v7 = vpop.f32.mrb[12].mxu1 }
 0x30f   :  { %v2246_v8 = vpop.f32.mrb[13].mxu1  ;;  %v2402_v18 = vadd.f32 %v1632_v7, %v1329_v17 }
 0x314   :  { %v1895_v11 = vpop.f32.mrb[4].mxu0 }
 0x315   :  { %v2399_v2 = vadd.f32 %v2398_v10, %v1895_v11  ;;  %v2291_v13 = vpop.f32.mrb[5].mxu0 }
 0x317   :  { %1911 = vst [vmem:[#allocation2] sm:$0xff] %v2399_v2 }
 0x318   :  { %v1901_v15 = vpop.f32.mrb[6].mxu0 }
 0x319   :  { %v2401_v50 = vadd.f32 %v2400_v12, %v1901_v15  ;;  %v2294_v16 = vpop.f32.mrb[7].mxu0 }
 0x31b   :  { %1912 = vst [vmem:[#allocation2 + $0x8] sm:$0xff] %v2401_v50 }
 0x31c   :  { %v1907_v19 = vpop.f32.mrb[8].mxu0 }
 0x31d   :  { %2485 = shalt.err (!%p2482_p4)
}
 0x31e   :  { %s2486_s26 = scalar_lea.hbm %s2876_s7, 256 }
 0x31f   :  { %p2487_p5 = scmp.ne.s32.totalorder %s2876_s7, %s2486_s26  ;;  %p2490_p6 = scmp.lt.u32.totalorder %s2486_s26, %s2876_s7 }
 0x321   :  { %p2492_p7 = pnand %p2490_p6, %p2487_p5 }
 0x323   :  { %2495 = shalt.err (!%p2492_p7)
}
 0x324   :  { %s2528_s9 = smov 128   ;;  %s2529_s4 = smov 8   ;;  %v2403_v20 = vadd.f32 %v2402_v18, %v1907_v19  ;;  %v2297_v21 = vpop.f32.mrb[9].mxu0 }
 0x325   :  { %1925 = dma.vmem_to_hbm [thread:$0]  %s1920_s21, 256, %s2876_s7, [#allocation3], %s2528_s9, %s2528_s9, %s2529_s4  }
 0x326   :  { %1913 = vst [vmem:[#allocation4] sm:$0xff] %v2403_v20  ;;  %s2496_s11 = scalar_lea.vmem %s1933_s2, 128  ;;  %p2501_p9 = scmp.lt.s32.totalorder %s1933_s2, %s1933_s2 }
 0x327   :  { %p2497_p8 = scmp.ne.s32.totalorder %s1933_s2, %s2496_s11  ;;  %p2502_p10 = scmp.lt.s32.totalorder %s2496_s11, %s2496_s11 }
 0x329   :  { %p2503_p11 = por %p2502_p10, %p2501_p9 }
 0x32b   :  { %p2504_p12 = pnand %p2503_p11, %p2497_p8 }
 0x32d   :  { %2507 = shalt.err (!%p2504_p12)
}
 0x32e   :  { %s2508_s14 = scalar_lea.hbm %s2877_s8, 128 }
 0x32f   :  { %p2509_p13 = scmp.ne.s32.totalorder %s2877_s8, %s2508_s14  ;;  %p2512_p0 = scmp.lt.u32.totalorder %s2508_s14, %s2877_s8 }
 0x331   :  { %p2514_p1 = pnand %p2512_p0, %p2509_p13 }
 0x333   :  { %2517 = shalt.err (!%p2514_p1)
}
 0x334   :  { %1935 = dma.vmem_to_hbm [thread:$0]  %s1933_s2, 128, %s2877_s8, [#allocation5]  }
 0x335   :  { %2518 = dma.done.wait [#allocation3], 256  }
 0x336   :  { %2519 = vsyncadd [#allocation3], 4294967040 }
 0x337   :  { %2520 = dma.done.wait [#allocation5], 128  }
 0x338   :  { %2521 = vsyncadd [#allocation5], 4294967168 }
 0x339   :  { %1942 = vsyncpa [#allocation3], 1 }
 0x33a   :  { %1943 = vsyncpa [#allocation5], 1 }

</bundles_post_ra>
